<compile_context>
chip_gen: v7x
topology: tpu7x:2x2x1
jax: 0.10.0
libtpu: 0.0.40
codegen_flags: <defaults>
</compile_context>

<pallas_src>
import functools

import jax
import jax.numpy as jnp
from jax.experimental import pallas as pl
from jax.experimental.pallas import tpu as pltpu


def _reflect_pad_flat(src, b_blk, batch_stride, t_valid, pad):
    """Per-batch ReflectionPad1d on a batch-flattened (rows, C) value.

    `src` holds batch b's valid rows at [b*batch_stride, b*batch_stride+t_valid).
    Returns a (b_blk*(t_valid + 2*pad), C) value, contiguous per batch,
    assembled with one concat so the caller can commit it with one store.
    """
    pieces = []
    for b in range(b_blk):
        o = b * batch_stride
        for i in range(pad):                          # left: x[pad], ..., x[1]
            r = o + pad - i
            pieces.append(src[r:r + 1, :])
        pieces.append(src[o:o + t_valid, :])          # body: x[0..t-1]
        for i in range(pad):                          # right: x[t-2], ..., x[t-1-pad]
            r = o + t_valid - 2 - i
            pieces.append(src[r:r + 1, :])
    return jnp.concatenate(pieces, axis=0)


def _encoder_fused_kernel(*refs, num_layers, b_blk, kernel_size, pad, t_ins,
                          negative_slope):
    """Whole conv stack for one batch block, batch-flattened time-major layout.

    refs layout:
      refs[0]                     input block (B_BLK*T0, C0) f32
      refs[1+2l], refs[2+2l]      layer-l weight (K*C_l, C_{l+1}) bf16,
                                  bias (1, C_{l+1}) f32
      refs[1+2*num_layers]        output block (B_BLK*t_last, C_last) f32
      refs[2+2*num_layers + l]    VMEM scratch: padded activation of layer l
    """
    x_ref = refs[0]
    w_refs = [refs[1 + 2 * l] for l in range(num_layers)]
    b_refs = [refs[2 + 2 * l] for l in range(num_layers)]
    out_ref = refs[1 + 2 * num_layers]
    s_refs = list(refs[2 + 2 * num_layers:])

    khalf = kernel_size // 2

    # Layer-0 source: the batch-flattened (B_BLK*T0, C0) input block.
    src = x_ref[...]
    batch_stride = t_ins[0]
    t_valid = t_ins[0]

    for l in range(num_layers):
        t_in = t_ins[l]
        t_pad = t_in + 2 * pad                    # even by construction
        t_out = (t_pad - kernel_size) // 2 + 1
        half = t_pad // 2                         # rows/batch in each parity slab

        # Reflection-pad every batch element; single store of the whole slab.
        s_refs[l][...] = _reflect_pad_flat(src, b_blk, batch_stride, t_valid, pad)

        # Even/odd time phases: two strided ref loads, cast to bf16 for the MXU.
        h_even = s_refs[l][pl.ds(0, b_blk * half, 2), :].astype(jnp.bfloat16)
        h_odd = s_refs[l][pl.ds(1, b_blk * half, 2), :].astype(jnp.bfloat16)

        # One wide-contraction matmul: lane-concat the 8 shifted windows so K
        # folds into the contraction (K*C_in); M = B_BLK*t_out (+ a few ignored
        # rows that straddle batch boundaries).
        m_use = b_blk * half - (khalf - 1)
        taps = []
        for j in range(khalf):
            taps.append(h_even[j:j + m_use, :])
            taps.append(h_odd[j:j + m_use, :])
        im2col = jnp.concatenate(taps, axis=-1)               # (m_use, K*C_in) bf16

        y = jnp.dot(im2col, w_refs[l][...],
                    preferred_element_type=jnp.float32)       # f32 accumulate
        y = y + b_refs[l][...]                                 # lane-dense bias row
        y = jnp.where(y >= 0, y, negative_slope * y)           # LeakyReLU(0.2)

        if l == num_layers - 1:
            # Compact the valid rows of each batch; one dense output store.
            out_val = jnp.concatenate(
                [y[b * half:b * half + t_out, :] for b in range(b_blk)], axis=0)
            out_ref[...] = out_val.astype(out_ref.dtype)
        else:
            src = y
            batch_stride = half
            t_valid = t_out


def _pick_batch_block(n, t0, t_last, max_block=32):
    """Largest divisor of n that (a) keeps block rows sublane-aligned,
    (b) targets matmul M ~ 256 at the deepest layer, and (c) leaves >= 2 grid
    steps when possible (so both v7x TensorCores get work)."""
    cap = min(n, max_block, max(1, -(-256 // max(t_last, 1))))

    def legal(d):
        in_ok = (d * t0) % 8 == 0 or d == n
        out_ok = (d * t_last) % 8 == 0 or d == n
        return in_ok and out_ok

    divs = [d for d in range(1, n + 1) if n % d == 0 and legal(d)]
    pref = [d for d in divs if d <= cap and n // d >= 2]
    if pref:
        return max(pref)
    ok = [d for d in divs if d <= cap]
    if ok:
        return max(ok)
    return n  # full-batch block is always BlockSpec-legal


def encoder_forward(x, weights, biases, *, kernel_size, pad, negative_slope=0.2):
    """x: (N, C0, T) f32 (PyTorch NCW); weights[l]: (C_{l+1}, C_l, K); biases[l]: (C_{l+1},)."""
    num_layers = len(weights)
    n, c0, t0 = x.shape

    # Per-layer input time extents (Conv1d stride=2 on reflection-padded input).
    t_ins = [t0]
    for _ in range(num_layers):
        t_in = t_ins[-1]
        # Same precondition as PyTorch ReflectionPad1d; even lengths keep the
        # even/odd phase decomposition aligned across the flattened batch.
        assert t_in > pad, f"sequence length {t_in} too short for ReflectionPad1d({pad})"
        assert t_in % 2 == 0, f"odd per-layer length {t_in} not supported"
        t_ins.append((t_in + 2 * pad - kernel_size) // 2 + 1)
    t_last = t_ins[-1]
    c_last = weights[-1].shape[0]
    assert t_last >= 1

    b_blk = _pick_batch_block(n, t0, t_last)

    # NCW -> NWC (channels on lanes) then flatten batch into rows; the reshape
    # to 2-D is a free row-major view in HBM.
    x2d = jnp.transpose(x, (0, 2, 1)).astype(jnp.float32).reshape(n * t0, c0)

    # Weights as (K*C_in, C_out) bf16 (tap-folded contraction); biases as
    # lane-dense (1, C_out) f32 rows.
    w_args = [jnp.transpose(w, (2, 1, 0)).reshape(-1, w.shape[0]).astype(jnp.bfloat16)
              for w in weights]
    b_args = [b.reshape(1, -1).astype(jnp.float32) for b in biases]

    in_specs = [pl.BlockSpec((b_blk * t0, c0), lambda i: (i, 0))]
    inputs = [x2d]
    for w2, b2 in zip(w_args, b_args):
        in_specs.append(pl.BlockSpec(w2.shape, lambda i: (0, 0)))
        in_specs.append(pl.BlockSpec(b2.shape, lambda i: (0, 0)))
        inputs.extend([w2, b2])

    # Per-layer padded-activation scratch (f32; bf16 operands are produced right
    # after the strided loads, before the MXU).
    scratch_shapes = [
        pltpu.VMEM((b_blk * (t_ins[l] + 2 * pad), weights[l].shape[1]), jnp.float32)
        for l in range(num_layers)
    ]

    kernel = functools.partial(
        _encoder_fused_kernel,
        num_layers=num_layers,
        b_blk=b_blk,
        kernel_size=kernel_size,
        pad=pad,
        t_ins=tuple(t_ins[:-1]),
        negative_slope=negative_slope,
    )

    out2d = pl.pallas_call(
        kernel,
        out_shape=jax.ShapeDtypeStruct((n * t_last, c_last), jnp.float32),
        grid_spec=pltpu.PrefetchScalarGridSpec(
            num_scalar_prefetch=0,
            grid=(n // b_blk,),
            in_specs=in_specs,
            out_specs=pl.BlockSpec((b_blk * t_last, c_last), lambda i: (i, 0)),
            scratch_shapes=scratch_shapes,
        ),
        compiler_params=pltpu.CompilerParams(
            dimension_semantics=("parallel",)),
    )(*inputs)

    # (N*t_last, C_last) -> (N, C_last, t_last) to match the PyTorch NCW output.
    return jnp.transpose(out2d.reshape(n, t_last, c_last), (0, 2, 1))


class EncoderPallas:
    """Mirror of the PyTorch Encoder with default args (no pool / compress)."""

    def __init__(self, channels, kernel_size=8, key=None):
        if key is None:
            key = jax.random.PRNGKey(0)
        self.channels = tuple(channels)
        self.kernel_size = kernel_size
        self.pad = (kernel_size - 2) // 2          # convpool is None branch
        self.stride = 2
        weights, biases = [], []
        for i in range(len(channels) - 1):
            key, kw, kb = jax.random.split(key, 3)
            c_in, c_out = channels[i], channels[i + 1]
            fan_in = c_in * kernel_size
            bound = 1.0 / (fan_in ** 0.5)
            weights.append(jax.random.uniform(
                kw, (c_out, c_in, kernel_size), jnp.float32, -bound, bound))
            biases.append(jax.random.uniform(
                kb, (c_out,), jnp.float32, -bound, bound))
        self.weights = tuple(weights)
        self.biases = tuple(biases)
        # Whole forward (layout glue + fused Pallas kernel) under a single jit.
        self._forward = jax.jit(functools.partial(
            encoder_forward, kernel_size=kernel_size, pad=self.pad))

    def __call__(self, x):
        return self._forward(x, self.weights, self.biases)


def _reference_forward(x, weights, biases, *, pad, negative_slope=0.2):
    """Pure-JAX f32 reference (lax conv) for a correctness cross-check."""
    for w, b in zip(weights, biases):
        xp = jnp.pad(x, ((0, 0), (0, 0), (pad, pad)), mode="reflect")
        y = jax.lax.conv_general_dilated(
            xp, w, window_strides=(2,), padding="VALID",
            dimension_numbers=("NCH", "OIH", "NCH"))
        y = y + b[None, :, None]
        x = jnp.where(y >= 0, y, negative_slope * y)
    return x


if __name__ == "__main__":
    key = jax.random.PRNGKey(0)
    k_in, k_params = jax.random.split(key)

    # small shapes: batch=4, channels=(4, 16, 32), seq=16
    channels = (4, 16, 32)
    N, T = 4, 16
    x = jax.random.normal(k_in, (N, channels[0], T), dtype=jnp.float32)

    enc = EncoderPallas(channels, kernel_size=8, key=k_params)

    out = jax.block_until_ready(enc(x))
    ref = jax.block_until_ready(
        _reference_forward(x, enc.weights, enc.biases, pad=enc.pad))

    assert out.shape == (N, channels[-1], T // 4), out.shape
    # bf16 matmul operands (f32 accumulate) vs. pure-f32 reference -> loose tol.
    assert jnp.allclose(out, ref, atol=2e-2, rtol=2e-2), (
        float(jnp.max(jnp.abs(out - ref))))

    print("KERNEL_OK")
</pallas_src>

<mosaic_0001>
module attributes {stable_mosaic.version = 11 : i64} {
  func.func @_encoder_fused_kernel(%arg0: i32, %arg1: memref<32x4xf32, #tpu.memory_space<vmem>>, %arg2: memref<32x16xbf16, #tpu.memory_space<vmem>>, %arg3: memref<1x16xf32, #tpu.memory_space<vmem>>, %arg4: memref<128x32xbf16, #tpu.memory_space<vmem>>, %arg5: memref<1x32xf32, #tpu.memory_space<vmem>>, %arg6: memref<8x32xf32, #tpu.memory_space<vmem>>, %arg7: memref<44x4xf32, #tpu.memory_space<vmem>>, %arg8: memref<28x16xf32, #tpu.memory_space<vmem>>) attributes {dimension_semantics = [#tpu.dimension_semantics<parallel>], iteration_bounds = array<i64: 2>, scalar_prefetch = 0 : i64, scratch_operands = 2 : i64, tpu.core_type = #tpu.core_type<tc>, window_params = [{transform_indices = @transform_0, window_bounds = array<i64: 32, 4>}, {pipeline_mode = #tpu.pipeline_mode<synchronous>, transform_indices = @transform_1, window_bounds = array<i64: 32, 16>}, {pipeline_mode = #tpu.pipeline_mode<synchronous>, transform_indices = @transform_2, window_bounds = array<i64: 1, 16>}, {pipeline_mode = #tpu.pipeline_mode<synchronous>, transform_indices = @transform_3, window_bounds = array<i64: 128, 32>}, {pipeline_mode = #tpu.pipeline_mode<synchronous>, transform_indices = @transform_4, window_bounds = array<i64: 1, 32>}, {transform_indices = @transform_5, window_bounds = array<i64: 8, 32>}]} {
    %c0 = arith.constant 0 : index
    %c0_0 = arith.constant 0 : index
    %0 = vector.load %arg1[%c0, %c0_0] : memref<32x4xf32, #tpu.memory_space<vmem>>, vector<32x4xf32>
    %1 = vector.extract_strided_slice %0 {offsets = [3, 0], sizes = [1, 4], strides = [1, 1]} : vector<32x4xf32> to vector<1x4xf32>
    %2 = vector.extract_strided_slice %0 {offsets = [2, 0], sizes = [1, 4], strides = [1, 1]} : vector<32x4xf32> to vector<1x4xf32>
    %3 = vector.extract_strided_slice %0 {offsets = [1, 0], sizes = [1, 4], strides = [1, 1]} : vector<32x4xf32> to vector<1x4xf32>
    %4 = vector.extract_strided_slice %0 {offsets = [0, 0], sizes = [16, 4], strides = [1, 1]} : vector<32x4xf32> to vector<16x4xf32>
    %5 = vector.extract_strided_slice %0 {offsets = [14, 0], sizes = [1, 4], strides = [1, 1]} : vector<32x4xf32> to vector<1x4xf32>
    %6 = vector.extract_strided_slice %0 {offsets = [13, 0], sizes = [1, 4], strides = [1, 1]} : vector<32x4xf32> to vector<1x4xf32>
    %7 = vector.extract_strided_slice %0 {offsets = [12, 0], sizes = [1, 4], strides = [1, 1]} : vector<32x4xf32> to vector<1x4xf32>
    %8 = vector.extract_strided_slice %0 {offsets = [19, 0], sizes = [1, 4], strides = [1, 1]} : vector<32x4xf32> to vector<1x4xf32>
    %9 = vector.extract_strided_slice %0 {offsets = [18, 0], sizes = [1, 4], strides = [1, 1]} : vector<32x4xf32> to vector<1x4xf32>
    %10 = vector.extract_strided_slice %0 {offsets = [17, 0], sizes = [1, 4], strides = [1, 1]} : vector<32x4xf32> to vector<1x4xf32>
    %11 = vector.extract_strided_slice %0 {offsets = [16, 0], sizes = [16, 4], strides = [1, 1]} : vector<32x4xf32> to vector<16x4xf32>
    %12 = vector.extract_strided_slice %0 {offsets = [30, 0], sizes = [1, 4], strides = [1, 1]} : vector<32x4xf32> to vector<1x4xf32>
    %13 = vector.extract_strided_slice %0 {offsets = [29, 0], sizes = [1, 4], strides = [1, 1]} : vector<32x4xf32> to vector<1x4xf32>
    %14 = vector.extract_strided_slice %0 {offsets = [28, 0], sizes = [1, 4], strides = [1, 1]} : vector<32x4xf32> to vector<1x4xf32>
    %15 = tpu.concatenate %1, %2, %3, %4, %5, %6, %7, %8, %9, %10, %11, %12, %13, %14 in 0 : vector<1x4xf32>, vector<1x4xf32>, vector<1x4xf32>, vector<16x4xf32>, vector<1x4xf32>, vector<1x4xf32>, vector<1x4xf32>, vector<1x4xf32>, vector<1x4xf32>, vector<1x4xf32>, vector<16x4xf32>, vector<1x4xf32>, vector<1x4xf32>, vector<1x4xf32> -> vector<44x4xf32>
    %c0_1 = arith.constant 0 : index
    %c0_2 = arith.constant 0 : index
    %16 = vector.load %arg7[%c0_1, %c0_2] : memref<44x4xf32, #tpu.memory_space<vmem>>, vector<44x4xf32>
    tpu.vector_store %arg7[%c0_1, %c0_2], %15 {strides = array<i32>} : memref<44x4xf32, #tpu.memory_space<vmem>>, vector<44x4xf32>,
    %c0_3 = arith.constant 0 : index
    %c0_4 = arith.constant 0 : index
    %17 = tpu.strided_load %arg7[%c0_3, %c0_4] {strides = array<i32: 2, 1>} : memref<44x4xf32, #tpu.memory_space<vmem>>, vector<22x4xf32>
    %18 = arith.truncf %17 : vector<22x4xf32> to vector<22x4xbf16>
    %c1 = arith.constant 1 : index
    %c0_5 = arith.constant 0 : index
    %19 = tpu.strided_load %arg7[%c1, %c0_5] {strides = array<i32: 2, 1>} : memref<44x4xf32, #tpu.memory_space<vmem>>, vector<22x4xf32>
    %20 = arith.truncf %19 : vector<22x4xf32> to vector<22x4xbf16>
    %21 = vector.extract_strided_slice %18 {offsets = [0, 0], sizes = [19, 4], strides = [1, 1]} : vector<22x4xbf16> to vector<19x4xbf16>
    %22 = vector.extract_strided_slice %20 {offsets = [0, 0], sizes = [19, 4], strides = [1, 1]} : vector<22x4xbf16> to vector<19x4xbf16>
    %23 = vector.extract_strided_slice %18 {offsets = [1, 0], sizes = [19, 4], strides = [1, 1]} : vector<22x4xbf16> to vector<19x4xbf16>
    %24 = vector.extract_strided_slice %20 {offsets = [1, 0], sizes = [19, 4], strides = [1, 1]} : vector<22x4xbf16> to vector<19x4xbf16>
    %25 = vector.extract_strided_slice %18 {offsets = [2, 0], sizes = [19, 4], strides = [1, 1]} : vector<22x4xbf16> to vector<19x4xbf16>
    %26 = vector.extract_strided_slice %20 {offsets = [2, 0], sizes = [19, 4], strides = [1, 1]} : vector<22x4xbf16> to vector<19x4xbf16>
    %27 = vector.extract_strided_slice %18 {offsets = [3, 0], sizes = [19, 4], strides = [1, 1]} : vector<22x4xbf16> to vector<19x4xbf16>
    %28 = vector.extract_strided_slice %20 {offsets = [3, 0], sizes = [19, 4], strides = [1, 1]} : vector<22x4xbf16> to vector<19x4xbf16>
    %29 = tpu.concatenate %21, %22, %23, %24, %25, %26, %27, %28 in 1 : vector<19x4xbf16>, vector<19x4xbf16>, vector<19x4xbf16>, vector<19x4xbf16>, vector<19x4xbf16>, vector<19x4xbf16>, vector<19x4xbf16>, vector<19x4xbf16> -> vector<19x32xbf16>
    %c0_6 = arith.constant 0 : index
    %c0_7 = arith.constant 0 : index
    %30 = vector.load %arg2[%c0_6, %c0_7] : memref<32x16xbf16, #tpu.memory_space<vmem>>, vector<32x16xbf16>
    %cst = arith.constant dense<0.000000e+00> : vector<19x16xf32>
    %31 = tpu.matmul %29, %30, %cst {dimension_numbers = #tpu.dot_dimension_numbers<[1], [0], [0], [1], [0, 0, 1, 1], [], []>} : vector<19x32xbf16>, vector<32x16xbf16>, vector<19x16xf32> -> vector<19x16xf32>
    %c0_8 = arith.constant 0 : index
    %c0_9 = arith.constant 0 : index
    %32 = vector.load %arg3[%c0_8, %c0_9] : memref<1x16xf32, #tpu.memory_space<vmem>>, vector<1x16xf32>
    %33 = vector.broadcast %32 : vector<1x16xf32> to vector<19x16xf32>
    %34 = arith.addf %31, %33 : vector<19x16xf32>
    %cst_10 = arith.constant 0.000000e+00 : f32
    %35 = vector.broadcast %cst_10 : f32 to vector<19x16xf32>
    %36 = arith.cmpf oge, %34, %35 : vector<19x16xf32>
    %cst_11 = arith.constant 2.000000e-01 : f32
    %37 = vector.broadcast %cst_11 : f32 to vector<19x16xf32>
    %38 = arith.mulf %37, %34 : vector<19x16xf32>
    %39 = arith.select %36, %34, %38 : vector<19x16xi1>, vector<19x16xf32>
    %40 = vector.extract_strided_slice %39 {offsets = [3, 0], sizes = [1, 16], strides = [1, 1]} : vector<19x16xf32> to vector<1x16xf32>
    %41 = vector.extract_strided_slice %39 {offsets = [2, 0], sizes = [1, 16], strides = [1, 1]} : vector<19x16xf32> to vector<1x16xf32>
    %42 = vector.extract_strided_slice %39 {offsets = [1, 0], sizes = [1, 16], strides = [1, 1]} : vector<19x16xf32> to vector<1x16xf32>
    %43 = vector.extract_strided_slice %39 {offsets = [0, 0], sizes = [8, 16], strides = [1, 1]} : vector<19x16xf32> to vector<8x16xf32>
    %44 = vector.extract_strided_slice %39 {offsets = [6, 0], sizes = [1, 16], strides = [1, 1]} : vector<19x16xf32> to vector<1x16xf32>
    %45 = vector.extract_strided_slice %39 {offsets = [5, 0], sizes = [1, 16], strides = [1, 1]} : vector<19x16xf32> to vector<1x16xf32>
    %46 = vector.extract_strided_slice %39 {offsets = [4, 0], sizes = [1, 16], strides = [1, 1]} : vector<19x16xf32> to vector<1x16xf32>
    %47 = vector.extract_strided_slice %39 {offsets = [14, 0], sizes = [1, 16], strides = [1, 1]} : vector<19x16xf32> to vector<1x16xf32>
    %48 = vector.extract_strided_slice %39 {offsets = [13, 0], sizes = [1, 16], strides = [1, 1]} : vector<19x16xf32> to vector<1x16xf32>
    %49 = vector.extract_strided_slice %39 {offsets = [12, 0], sizes = [1, 16], strides = [1, 1]} : vector<19x16xf32> to vector<1x16xf32>
    %50 = vector.extract_strided_slice %39 {offsets = [11, 0], sizes = [8, 16], strides = [1, 1]} : vector<19x16xf32> to vector<8x16xf32>
    %51 = vector.extract_strided_slice %39 {offsets = [17, 0], sizes = [1, 16], strides = [1, 1]} : vector<19x16xf32> to vector<1x16xf32>
    %52 = vector.extract_strided_slice %39 {offsets = [16, 0], sizes = [1, 16], strides = [1, 1]} : vector<19x16xf32> to vector<1x16xf32>
    %53 = vector.extract_strided_slice %39 {offsets = [15, 0], sizes = [1, 16], strides = [1, 1]} : vector<19x16xf32> to vector<1x16xf32>
    %54 = tpu.concatenate %40, %41, %42, %43, %44, %45, %46, %47, %48, %49, %50, %51, %52, %53 in 0 : vector<1x16xf32>, vector<1x16xf32>, vector<1x16xf32>, vector<8x16xf32>, vector<1x16xf32>, vector<1x16xf32>, vector<1x16xf32>, vector<1x16xf32>, vector<1x16xf32>, vector<1x16xf32>, vector<8x16xf32>, vector<1x16xf32>, vector<1x16xf32>, vector<1x16xf32> -> vector<28x16xf32>
    %c0_12 = arith.constant 0 : index
    %c0_13 = arith.constant 0 : index
    %55 = vector.load %arg8[%c0_12, %c0_13] : memref<28x16xf32, #tpu.memory_space<vmem>>, vector<28x16xf32>
    tpu.vector_store %arg8[%c0_12, %c0_13], %54 {strides = array<i32>} : memref<28x16xf32, #tpu.memory_space<vmem>>, vector<28x16xf32>,
    %c0_14 = arith.constant 0 : index
    %c0_15 = arith.constant 0 : index
    %56 = tpu.strided_load %arg8[%c0_14, %c0_15] {strides = array<i32: 2, 1>} : memref<28x16xf32, #tpu.memory_space<vmem>>, vector<14x16xf32>
    %57 = arith.truncf %56 : vector<14x16xf32> to vector<14x16xbf16>
    %c1_16 = arith.constant 1 : index
    %c0_17 = arith.constant 0 : index
    %58 = tpu.strided_load %arg8[%c1_16, %c0_17] {strides = array<i32: 2, 1>} : memref<28x16xf32, #tpu.memory_space<vmem>>, vector<14x16xf32>
    %59 = arith.truncf %58 : vector<14x16xf32> to vector<14x16xbf16>
    %60 = vector.extract_strided_slice %57 {offsets = [0, 0], sizes = [11, 16], strides = [1, 1]} : vector<14x16xbf16> to vector<11x16xbf16>
    %61 = vector.extract_strided_slice %59 {offsets = [0, 0], sizes = [11, 16], strides = [1, 1]} : vector<14x16xbf16> to vector<11x16xbf16>
    %62 = vector.extract_strided_slice %57 {offsets = [1, 0], sizes = [11, 16], strides = [1, 1]} : vector<14x16xbf16> to vector<11x16xbf16>
    %63 = vector.extract_strided_slice %59 {offsets = [1, 0], sizes = [11, 16], strides = [1, 1]} : vector<14x16xbf16> to vector<11x16xbf16>
    %64 = vector.extract_strided_slice %57 {offsets = [2, 0], sizes = [11, 16], strides = [1, 1]} : vector<14x16xbf16> to vector<11x16xbf16>
    %65 = vector.extract_strided_slice %59 {offsets = [2, 0], sizes = [11, 16], strides = [1, 1]} : vector<14x16xbf16> to vector<11x16xbf16>
    %66 = vector.extract_strided_slice %57 {offsets = [3, 0], sizes = [11, 16], strides = [1, 1]} : vector<14x16xbf16> to vector<11x16xbf16>
    %67 = vector.extract_strided_slice %59 {offsets = [3, 0], sizes = [11, 16], strides = [1, 1]} : vector<14x16xbf16> to vector<11x16xbf16>
    %68 = tpu.concatenate %60, %61, %62, %63, %64, %65, %66, %67 in 1 : vector<11x16xbf16>, vector<11x16xbf16>, vector<11x16xbf16>, vector<11x16xbf16>, vector<11x16xbf16>, vector<11x16xbf16>, vector<11x16xbf16>, vector<11x16xbf16> -> vector<11x128xbf16>
    %c0_18 = arith.constant 0 : index
    %c0_19 = arith.constant 0 : index
    %69 = vector.load %arg4[%c0_18, %c0_19] : memref<128x32xbf16, #tpu.memory_space<vmem>>, vector<128x32xbf16>
    %cst_20 = arith.constant dense<0.000000e+00> : vector<11x32xf32>
    %70 = tpu.matmul %68, %69, %cst_20 {dimension_numbers = #tpu.dot_dimension_numbers<[1], [0], [0], [1], [0, 0, 1, 1], [], []>} : vector<11x128xbf16>, vector<128x32xbf16>, vector<11x32xf32> -> vector<11x32xf32>
    %c0_21 = arith.constant 0 : index
    %c0_22 = arith.constant 0 : index
    %71 = vector.load %arg5[%c0_21, %c0_22] : memref<1x32xf32, #tpu.memory_space<vmem>>, vector<1x32xf32>
    %72 = vector.broadcast %71 : vector<1x32xf32> to vector<11x32xf32>
    %73 = arith.addf %70, %72 : vector<11x32xf32>
    %cst_23 = arith.constant 0.000000e+00 : f32
    %74 = vector.broadcast %cst_23 : f32 to vector<11x32xf32>
    %75 = arith.cmpf oge, %73, %74 : vector<11x32xf32>
    %cst_24 = arith.constant 2.000000e-01 : f32
    %76 = vector.broadcast %cst_24 : f32 to vector<11x32xf32>
    %77 = arith.mulf %76, %73 : vector<11x32xf32>
    %78 = arith.select %75, %73, %77 : vector<11x32xi1>, vector<11x32xf32>
    %79 = vector.extract_strided_slice %78 {offsets = [0, 0], sizes = [4, 32], strides = [1, 1]} : vector<11x32xf32> to vector<4x32xf32>
    %80 = vector.extract_strided_slice %78 {offsets = [7, 0], sizes = [4, 32], strides = [1, 1]} : vector<11x32xf32> to vector<4x32xf32>
    %81 = tpu.concatenate %79, %80 in 0 : vector<4x32xf32>, vector<4x32xf32> -> vector<8x32xf32>
    %c0_25 = arith.constant 0 : index
    %c0_26 = arith.constant 0 : index
    %82 = vector.load %arg6[%c0_25, %c0_26] : memref<8x32xf32, #tpu.memory_space<vmem>>, vector<8x32xf32>
    tpu.vector_store %arg6[%c0_25, %c0_26], %81 {strides = array<i32>} : memref<8x32xf32, #tpu.memory_space<vmem>>, vector<8x32xf32>,
    return
  }
  func.func @transform_0(%arg0: i32) -> (i32, i32) {
    %c0_i32 = arith.constant 0 : i32
    %c0_i32_0 = arith.constant 0 : i32
    return %arg0, %c0_i32 : i32, i32
  }
  func.func @transform_1(%arg0: i32) -> (i32, i32) {
    %c0_i32 = arith.constant 0 : i32
    %c0_i32_0 = arith.constant 0 : i32
    %c0_i32_1 = arith.constant 0 : i32
    return %c0_i32, %c0_i32_0 : i32, i32
  }
  func.func @transform_2(%arg0: i32) -> (i32, i32) {
    %c0_i32 = arith.constant 0 : i32
    %c0_i32_0 = arith.constant 0 : i32
    %c0_i32_1 = arith.constant 0 : i32
    return %c0_i32, %c0_i32_0 : i32, i32
  }
  func.func @transform_3(%arg0: i32) -> (i32, i32) {
    %c0_i32 = arith.constant 0 : i32
    %c0_i32_0 = arith.constant 0 : i32
    %c0_i32_1 = arith.constant 0 : i32
    return %c0_i32, %c0_i32_0 : i32, i32
  }
  func.func @transform_4(%arg0: i32) -> (i32, i32) {
    %c0_i32 = arith.constant 0 : i32
    %c0_i32_0 = arith.constant 0 : i32
    %c0_i32_1 = arith.constant 0 : i32
    return %c0_i32, %c0_i32_0 : i32, i32
  }
  func.func @transform_5(%arg0: i32) -> (i32, i32) {
    %c0_i32 = arith.constant 0 : i32
    %c0_i32_0 = arith.constant 0 : i32
    return %arg0, %c0_i32 : i32, i32
  }
}

</mosaic_0001>

<bundles_post_ra>
// kernel: encoder_forward.1
= control target key start
LH: loop header
LB: loop body
LE: loop exit
PB: predicated region body
PF: predicated region fallthrough
CT: control target
= control target key end

     0   :  { %10 = vsyncpa [#allocation5], 0  ;;  %s1269_s0 = inlined_call_operand.vmem [shape: f32[64,4], index: 0, kind: input, shape index: {}]   ;;  %s1270_s1 = inlined_call_operand.vmem [shape: bf16[32,16], index: 1, kind: input, shape index: {}]   ;;  %s1271_s2 = inlined_call_operand.vmem [shape: f32[1,16], index: 2, kind: input, shape index: {}]   ;;  %s1272_s3 = inlined_call_operand.vmem [shape: bf16[128,32], index: 3, kind: input, shape index: {}]   ;;  %s1273_s4 = inlined_call_operand.vmem [shape: f32[1,32], index: 4, kind: input, shape index: {}]   ;;  %s1274_s5 = inlined_call_operand.hbm [shape: f32[16,32], index: 5, kind: output, shape index: {}]  }
   0x1   :  { %12 = vsyncpa [#allocation5 + $0x1], 0  ;;  %s1061_s18 = smov 0   ;;  %s1063_s19 = smov 0  }
   0x2   :  { %s1065_s20 = smov 0   ;;  %s1067_s21 = smov 0  }
   0x3 LB: > { %s1082_s22 = sadd.s32 4294967295, %s1013_s21   ;;  %s821_s23 = sadd.s32 4294967294, %s1013_s21   ;;  %s1013_s21 = sphi %s1067_s21, %s1280_s21   ;;  %s1009_s20 = sphi %s1065_s20, %s1279_s20   ;;  %s1005_s19 = sphi %s1063_s19, %s1278_s19   ;;  %s1001_s18 = sphi %s1061_s18, %s1277_s18  }
   0x4   : > { %s1086_s24 = sadd.s32 1, %s1013_s21   ;;  %s135_s25 = sadd.s32 1, %s1009_s20 }
   0x5   : > { %s132_s26 = ssub.s32 %s1013_s21, %s1086_s24  ;;  %p145_p0 = scmp.ne.s32.totalorder %s1009_s20, %s1005_s19 }
   0x6   : > { %p133_p1 = scmp.eq.s32.totalorder %s132_s26, 0  ;;  %p146_p2 = scmp.eq.s32.totalorder %s1082_s22, 1 }
   0x7   : > { %p151_p3 = scmp.ne.s32.totalorder %s1005_s19, %s1001_s18  ;;  %p152_p4 = scmp.eq.s32.totalorder %s821_s23, 1 }
   0x8   : > { %s1097_s27 = scalar_select %p133_p1, %s1009_s20, %s135_s25  }
   0x9   : > { %p1099_p5 = por %p146_p2, %p145_p0  ;;  %p1103_p6 = por %p152_p4, %p151_p3 }
   0xa   : > { %p824_p7 = scmp.ge.s32.totalorder %s1013_s21, 1  ;;  %p191_p8 = scmp.lt.s32.totalorder %s1013_s21, 3 }
   0xc   : > { %p192_p9 = pnand %p824_p7, %p191_p8 }
   0xd   : > { %s826_s30 = sshll.u32 (!%p192_p9), %s1082_s22, 2  ;;  %vm238_vm0 = vcmask (!%p192_p9), 1042432   ;;  %vm259_vm1 = vcmask (!%p192_p9), 1040384   ;;  %vm273_vm2 = vcmask (!%p192_p9), 1041408   ;;  %vm289_vm3 = vcmask (!%p192_p9), 31744   ;;  %s1015_s10 = smov (!%p192_p9), 4  }
   0xe   : > { %195 = sbr.rel (%p192_p9) target bundleno = 783 (0x30f), region = 40  ;;  %p220_p10 = scmp.lt.s32.totalorder (!%p192_p9), %s826_s30, 7  ;;  %vm295_vm4 = vcmask (!%p192_p9), 27648   ;;  %vm277_vm5 = vcmask (!%p192_p9), 1043456   ;;  %vm279_vm6 = vcmask (!%p192_p9), 1044480   ;;  %vm281_vm7 = vcmask (!%p192_p9), 1045504  }
   0xf   : > { %vm283_vm8 = vcmask (!%p192_p9), 1046528   ;;  %s1016_s11 = smov (!%p192_p9), 16   ;;  %v941_v55 = vld [vmem:[%s1270_s1] sm:$0xff] (!%p192_p9)   ;;  %s1017_s14 = smov (!%p192_p9), 20   ;;  %vm318_vm9 = vsmask.f32 (!%p192_p9), 7424 }
  0x10   : > { %859 = vmatprep.subr.bf16.mxu0 (!%p192_p9), %v941_v55  ;;  %s1018_s17 = smov (!%p192_p9), 8   ;;  %s1019_s23 = smov (!%p192_p9), 12   ;;  %vm374_vm10 = vsmask.f32 (!%p192_p9), 6400  ;;  %vm401_vm11 = vcmask (!%p192_p9), 64512   ;;  %vm406_vm12 = vcmask (!%p192_p9), 97280  }
  0x11   : > { %860 = vmatpush3.bf16.msra.mxu0 (!%p192_p9), %v941_v55  ;;  %s1020_s25 = smov (!%p192_p9), 24   ;;  %s1021_s26 = smov (!%p192_p9), 28   ;;  %vm411_vm13 = vcmask (!%p192_p9), 130048   ;;  %vm421_vm14 = vcmask (!%p192_p9), 195584   ;;  %vm416_vm15 = vcmask (!%p192_p9), 162816  }
  0x12   : > { %s1024_s8 = smov (!%p192_p9), 64   ;;  %s1028_s12 = smov (!%p192_p9), 96  }
  0x13   : > { %s1029_s13 = smov (!%p192_p9), 112   ;;  %s216_s16 = sand.u32 (!%p192_p9), 1, %s1005_s19  }
  0x15   : > { %s1282_s30 = smov (!%p220_p10, %s826_s30), 7 }
  0x16   : > { %s827_s6 = sshll.u32 %s1282_s30, 3 }
  0x17   : > { %s223_s9 = scalar_lea.vmem %s1269_s0, %s827_s6 }
  0x18   : > { %v228_v0 = vld [vmem:[%s223_s9 + $0x10] sm:$0xff]  ;;  %v229_v1 = vld [vmem:[%s223_s9 + $0x18] sm:$0xff]  ;;  %v226_v2 = vld [vmem:[%s223_s9] sm:$0xff] }
  0x19   : > { %v260_v3 = vrot.slane %v228_v0, 7  ;;  %v261_v4 = vrot.slane %v229_v1, 7  ;;  %v266_v5 = vrot.slane %v229_v1, 5  ;;  %v268_v6 = vrot.slane %v229_v1, 3  ;;  %v227_v7 = vld [vmem:[%s223_s9 + $0x8] sm:$0xff]  ;;  %s1025_s9 = smov 80  }
  0x1a   : > { %v270_v8 = vrot.slane %v229_v1, 1  ;;  %v231_v9 = vrot.slane %v226_v2, 3  ;;  %v233_v10 = vrot.slane %v226_v2, 1  ;;  %v235_v11 = vrot.slane %v226_v2, 7 }
  0x1b   : > { %v262_v12 = vsel %vm259_vm1, %v260_v3, %v261_v4  ;;  %v286_v13 = vsel %vm259_vm1, %v261_v4, %v266_v5  ;;  %v239_v14 = vrot.slane %v226_v2, 5  ;;  %v240_v15 = vrot.slane %v227_v7, 5  ;;  %v942_v2 = vld [vmem:[%s1270_s1 + $0x8] sm:$0xff]  }
  0x1c   : > { %v287_v16 = vsel %vm273_vm2, %v286_v13, %v268_v6  ;;  %294 = vst.msk [vmem:[#allocation2 + $0x20] sm:$0xff] %vm289_vm3, %v262_v12  ;;  %v245_v17 = vrot.slane %v227_v7, 3  ;;  %v247_v18 = vrot.slane %v227_v7, 1  ;;  %v249_v19 = vrot.slane %v227_v7, 7  ;;  %861 = vmatprep.subr.bf16.mxu0 %v942_v2 }
  0x1d   : > { %v288_v20 = vsel %vm238_vm0, %v287_v16, %v270_v8  ;;  %v241_v21 = vsel %vm238_vm0, %v239_v14, %v240_v15  ;;  %v252_v22 = vrot.slane %v228_v0, 5  ;;  %v254_v23 = vrot.slane %v228_v0, 3  ;;  %862 = vmatpush3.bf16.msra.mxu0 %v942_v2 }
  0x1e   : > { %296 = vst.msk [vmem:[#allocation2 + $0x28] sm:$0xf] %vm295_vm4, %v288_v20  ;;  %v256_v24 = vrot.slane %v228_v0, 1  ;;  %v272_v25 = vsel %vm259_vm1, %v231_v9, %v233_v10  ;;  %v276_v26 = vsel %vm238_vm0, %v240_v15, %v245_v17  ;;  %vm426_vm4 = vcmask 228352  }
  0x1f   : > { %291 = vst.msk [vmem:[#allocation2 + $0x8] sm:$0xff] %vm289_vm3, %v241_v21  ;;  %v274_v27 = vsel %vm273_vm2, %v272_v25, %v235_v11  ;;  %v278_v28 = vsel %vm277_vm5, %v276_v26, %v247_v18 }
  0x20   : > { %v275_v29 = vsel %vm238_vm0, %v274_v27, %v239_v14  ;;  %v280_v30 = vsel %vm279_vm6, %v278_v28, %v249_v19  ;;  %v285_v31 = vsel %vm259_vm1, %v256_v24, %v260_v3 }
  0x21   : > { %v282_v32 = vsel %vm281_vm7, %v280_v30, %v252_v22  ;;  %290 = vst.msk [vmem:[#allocation2] sm:$0xff] %vm289_vm3, %v275_v29  ;;  %293 = vst.msk [vmem:[#allocation2 + $0x18] sm:$0xff] %vm289_vm3, %v285_v31 }
  0x22   : > { %v284_v33 = vsel %vm283_vm8, %v282_v32, %v254_v23 }
  0x23   : > { %292 = vst.msk [vmem:[#allocation2 + $0x10] sm:$0xff] %vm289_vm3, %v284_v33 }
  0x25   : > { %v309_v34 = vld [vmem:[#allocation2 + $0x21] ss:$2 sm:$0x3f]  ;;  %v301_v35 = vld [vmem:[#allocation2 + $0x20] ss:$2 sm:$0x3f] }
  0x26   : > { %v311_v36 = vpack.c.bf16 %v309_v34, %v309_v34  ;;  %v1133_v37 = vpack.c.bf16 %v301_v35, %v301_v35 }
  0x28   : > { %316 = vrot.lane.b32.xlu0 %v311_v36, %s1015_s10  ;;  %v361_v38 = vrot.slane %v1133_v37, 1  ;;  %v305_v39 = vld [vmem:[#allocation2 + $0x1] ss:$2 sm:$0xff]  ;;  %v297_v40 = vld [vmem:[#allocation2] ss:$2 sm:$0xff]  ;;  %v327_v41 = vshll.u32 %v1133_v37, 16 }
  0x29   : > { %v331_v42 = vshrl.u32 %v1133_v37, 16  ;;  %v346_v43 = vshll.u32 %v311_v36, 16  ;;  %v368_v45 = vrot.slane %v311_v36, 1  ;;  %v350_v50 = vshrl.u32 %v311_v36, 16 }
  0x2a   : > { %365 = vrot.lane.b32.xlu1 %v361_v38, %s1016_s11  ;;  %v307_v44 = vld [vmem:[#allocation2 + $0x11] ss:$2 sm:$0xff]  ;;  %v299_v46 = vld [vmem:[#allocation2 + $0x10] ss:$2 sm:$0xff]  ;;  %v329_v49 = vrot.slane %v327_v41, 1  ;;  %v379_v1 = vrot.slane %v327_v41, 2 }
  0x2b   : > { %v310_v47 = vpack.c.bf16 %v307_v44, %v305_v39  ;;  %v1139_v48 = vpack.c.bf16 %v299_v46, %v297_v40  ;;  %v348_v54 = vrot.slane %v346_v43, 1  ;;  %v378_v63 = vrot.slane %v331_v42, 1 }
  0x2c   : > { %v333_v52 = vor.u32 %v331_v42, %v329_v49  ;;  %v389_v8 = vrot.slane %v350_v50, 1  ;;  %v390_v10 = vrot.slane %v346_v43, 2 }
  0x2d   : > { %314 = vrot.lane.b32.xlu0 %v310_v47, %s1015_s10  ;;  %v360_v51 = vrot.slane %v1139_v48, 1  ;;  %v367_v53 = vrot.slane %v310_v47, 1  ;;  %v339_v56 = vshrl.u32 %v310_v47, 16  ;;  %v341_v57 = vshll.u32 %v310_v47, 16  ;;  %s1027_s10 = smov 48  }
  0x2e   : > { %372 = vrot.lane.b32.xlu1 %v368_v45, %s1017_s14  ;;  %v320_v58 = vshrl.u32 %v1139_v48, 16  ;;  %v322_v59 = vshll.u32 %v1139_v48, 16  ;;  %v352_v0 = vor.u32 %v350_v50, %v348_v54  ;;  %v380_v9 = vor.u32 %v379_v1, %v378_v63  ;;  %v944_v50 = vld [vmem:[%s1272_s3 + $0x8] sm:$0xff]  }
  0x2f   : > { %v362_v60 = vsel %vm283_vm8, %v360_v51, %v361_v38  ;;  %v343_v61 = vrot.slane %v341_v57, 1  ;;  %v369_v3 = vsel %vm283_vm8, %v367_v53, %v368_v45  ;;  %v386_v13 = vrot.slane %v339_v56, 1  ;;  %v945_v51 = vld [vmem:[%s1272_s3 + $0x10] sm:$0xff]   ;;  %v947_v53 = vld [vmem:[%s1272_s3 + $0x20] sm:$0xff]  }
  0x30   : > { %v324_v62 = vrot.slane %v322_v59, 1  ;;  %v375_v5 = vrot.slane %v320_v58, 1  ;;  %v376_v6 = vrot.slane %v322_v59, 2  ;;  %v387_v14 = vrot.slane %v341_v57, 2 }
  0x31   : > { %363 = vrot.lane.b32.xlu0 %v362_v60, %s1016_s11  ;;  %v344_v4 = vor.u32 %v343_v61, %v339_v56  ;;  %v391_v18 = vor.u32 %v390_v10, %v389_v8 }
  0x32   : > { %336 = vrot.lane.b32.xlu1 %v333_v52, %s1018_s17  ;;  %v325_v7 = vor.u32 %v324_v62, %v320_v58  ;;  %v377_v12 = vor.u32 %v376_v6, %v375_v5  ;;  %v388_v17 = vor.u32 %v387_v14, %v386_v13  ;;  %v946_v52 = vld [vmem:[%s1272_s3 + $0x18] sm:$0xff]  }
  0x33   : > { %v349_v11 = vsel %vm318_vm9, %v344_v4, %v348_v54  ;;  %v828_v54 = vld [vmem:[%s1271_s2] ss:$0 sm:$0xff] }
  0x34   : > { %v330_v15 = vsel %vm318_vm9, %v325_v7, %v329_v49  ;;  %v381_v16 = vsel %vm374_vm10, %v377_v12, %v380_v9  ;;  %v392_v19 = vsel %vm374_vm10, %v388_v17, %v391_v18  ;;  %vm454_vm9 = vcmask 261120  }
  0x35   : > { %370 = vrot.lane.b32.xlu0 %v369_v3, %s1017_s14  ;;  %v1022_v49 = vmov 0.0  }
  0x36   : > { %355 = vrot.lane.b32.xlu1 %v352_v0, %s1019_s23  ;;  %867 = vmatprep.subr.bf16.mxu1 %v1022_v49 }
  0x39   : > { %353 = vrot.lane.b32.xlu0 %v349_v11, %s1019_s23  ;;  %s843_s23 = sshll.u32 %s1082_s22, 7  ;;  %s749_s22 = scalar_lea.sflag [#allocation5], %s216_s16 }
  0x3a   : > { %334 = vrot.lane.b32.xlu1 %v330_v15, %s1018_s17  ;;  %s825_s17 = sshll.u32 %s216_s16, 3  ;;  %s1225_s7 = scalar_lea.hbm %s1274_s5, %s843_s23 }
  0x3d   : > { %382 = vrot.lane.b32.xlu0 %v381_v16, %s1020_s25 }
  0x3e   : > { %384 = vrot.lane.b32.xlu1 %v380_v9, %s1020_s25  ;;  %s218_s25 = scalar_lea.vmem [#allocation4], %s825_s17 }
  0x41   : > { %393 = vrot.lane.b32.xlu0 %v392_v19, %s1021_s26 }
  0x42   : > { %395 = vrot.lane.b32.xlu1 %v391_v18, %s1021_s26  ;;  %s762_s26 = sshll.u32 %s218_s25, 4  ;;  %s1227_s26 = int_to_ptr.vmem [resolvable:$true] %s762_s26 }
  0x9a   : > { %v317_v20 = vpop.permute.xlu0 %316 }
  0x9b   : > { %v400_v28 = vsel %vm289_vm3, %v1133_v37, %v317_v20 }
  0x9c   : > { %v366_v21 = vpop.permute.xlu1 %365 }
  0x9f   : > { %v315_v22 = vpop.permute.xlu0 %314 }
  0xa0   : > { %v373_v23 = vpop.permute.xlu1 %372  ;;  %v398_v30 = vsel %vm289_vm3, %v1139_v48, %v315_v22  ;;  %v943_v48 = vld [vmem:[%s1272_s3] sm:$0xff]  }
  0xa1   : > { %868 = vmatpush3.bf16.msra.mxu1 %v943_v48 }
  0xa2   : > { %869 = vmatprep.subr.bf16.mxu1 %v1022_v49 }
  0xa3   : > { %v364_v24 = vpop.permute.xlu0 %363 }
  0xa4   : > { %v337_v25 = vpop.permute.xlu1 %336 }
  0xa5   : > { %v405_v31 = vsel %vm401_vm11, %v400_v28, %v337_v25  ;;  %870 = vmatpush3.bf16.msra.mxu1 %v944_v50 }
  0xa6   : > { %871 = vmatprep.subr.bf16.mxu1 %v1022_v49 }
  0xa7   : > { %v371_v26 = vpop.permute.xlu0 %370 }
  0xa8   : > { %v356_v27 = vpop.permute.xlu1 %355 }
  0xa9   : > { %v410_v33 = vsel %vm406_vm12, %v405_v31, %v356_v27  ;;  %872 = vmatpush3.bf16.msra.mxu1 %v945_v51  ;;  %v949_v27 = vld [vmem:[%s1272_s3 + $0x30] sm:$0xff]  }
  0xaa   : > { %v415_v39 = vsel %vm411_vm13, %v410_v33, %v366_v21  ;;  %873 = vmatprep.subr.bf16.mxu1 %v1022_v49  ;;  %v950_v33 = vld [vmem:[%s1272_s3 + $0x38] sm:$0xff]  }
  0xab   : > { %v354_v29 = vpop.permute.xlu0 %353  ;;  %v420_v42 = vsel %vm416_vm15, %v415_v39, %v373_v23 }
  0xac   : > { %v335_v32 = vpop.permute.xlu1 %334 }
  0xad   : > { %v403_v34 = vsel %vm401_vm11, %v398_v30, %v335_v32  ;;  %874 = vmatpush3.bf16.msra.mxu1 %v946_v52 }
  0xae   : > { %v408_v35 = vsel %vm406_vm12, %v403_v34, %v354_v29  ;;  %875 = vmatprep.subr.bf16.mxu1 %v1022_v49  ;;  %vm553_vm12 = vcmask 125952  }
  0xaf   : > { %v383_v36 = vpop.permute.xlu0 %382  ;;  %v413_v38 = vsel %vm411_vm13, %v408_v35, %v364_v24 }
  0xb0   : > { %v418_v40 = vsel %vm416_vm15, %v413_v38, %v371_v26  ;;  %v385_v41 = vpop.permute.xlu1 %384  ;;  %v948_v26 = vld [vmem:[%s1272_s3 + $0x28] sm:$0xff]  }
  0xb1   : > { %v423_v37 = vsel %vm421_vm14, %v418_v40, %v383_v36  ;;  %v425_v44 = vsel %vm421_vm14, %v420_v42, %v385_v41  ;;  %876 = vmatpush3.bf16.msra.mxu1 %v947_v53  ;;  %vm618_vm14 = vcmask 916480  }
  0xb2   : > { %877 = vmatprep.subr.bf16.mxu1 %v1022_v49 }
  0xb3   : > { %v394_v43 = vpop.permute.xlu0 %393 }
  0xb4   : > { %v428_v45 = vsel %vm426_vm4, %v423_v37, %v394_v43  ;;  %v396_v46 = vpop.permute.xlu1 %395 }
  0xb5   : > { %863 = vmatprep.mubr.msk.bf16.mxu0 %vm454_vm9, %v428_v45  ;;  %v430_v47 = vsel %vm426_vm4, %v425_v44, %v396_v46  ;;  %878 = vmatpush3.bf16.msra.mxu1 %v948_v26 }
  0xb6   : > { %864 = vmatmul.mubr.msk.bf16.vlgmr.msra.gmra.mrb[0].mxu0 %vm454_vm9, %v430_v47  ;;  %879 = vmatprep.subr.bf16.mxu1 %v1022_v49 }
  0xb9   : > { %880 = vmatpush3.bf16.msra.mxu1 %v949_v27 }
  0xba   : > { %881 = vmatprep.subr.bf16.mxu1 %v1022_v49 }
  0xbd   : > { %882 = vmatpush3.bf16.msra.mxu1 %v950_v33 }
 0x189   : > { %v865_v55 = vpop.f32.mrb[0].mxu0 }
 0x18a   : > { %v502_v56 = vadd.f32 %v865_v55, %v828_v54  ;;  %v493_v57 = vpop.f32.mrb[1].mxu0 }
 0x18b   : > { %v494_v58 = vadd.f32 %v828_v54, %v493_v57  ;;  %v866_v59 = vpop.f32.mrb[2].mxu0 }
 0x18c   : > { %vm509_vm3 = vcmp.ge.f32.partialorder %v502_v56, 0.0  ;;  %v512_v60 = vmul.f32 0.2, %v502_v56  ;;  %v496_v61 = vpop.f32.mrb[3].mxu0 }
 0x18d   : > { %vm507_vm10 = vcmp.ge.f32.partialorder %v494_v58, 0.0  ;;  %v510_v62 = vmul.f32 0.2, %v494_v58  ;;  %v497_v63 = vadd.f32 %v828_v54, %v496_v61 }
 0x18e   : > { %v515_v0 = vsel %vm509_vm3, %v502_v56, %v512_v60 }
 0x18f   : > { %v532_v1 = vrot.slane %v515_v0, 2  ;;  %v536_v2 = vrot.slane %v515_v0, 6  ;;  %v513_v3 = vsel %vm507_vm10, %v494_v58, %v510_v62  ;;  %vm508_vm11 = vcmp.ge.f32.partialorder %v497_v63, 0.0 }
 0x190   : > { %v517_v4 = vrot.slane %v513_v3, 3  ;;  %v519_v5 = vrot.slane %v513_v3, 1  ;;  %v521_v6 = vrot.slane %v513_v3, 7  ;;  %v523_v7 = vrot.slane %v513_v3, 5 }
 0x191   : > { %v547_v8 = vsel %vm259_vm1, %v532_v1, %v515_v0  ;;  %v511_v9 = vmul.f32 0.2, %v497_v63 }
 0x192   : > { %v538_v10 = vsel %vm259_vm1, %v517_v4, %v519_v5  ;;  %v541_v11 = vsel %vm238_vm0, %v523_v7, %v517_v4  ;;  %v548_v12 = vsel %vm273_vm2, %v547_v8, %v536_v2 }
 0x193   : > { %v539_v13 = vsel %vm273_vm2, %v538_v10, %v521_v6  ;;  %v514_v14 = vsel %vm508_vm11, %v497_v63, %v511_v9  ;;  %v542_v15 = vsel %vm277_vm5, %v541_v11, %v519_v5  ;;  %vm609_vm2 = vcmask 523264  }
 0x194   : > { %v540_v16 = vsel %vm238_vm0, %v539_v13, %v523_v7  ;;  %v528_v17 = vrot.slane %v514_v14, 4  ;;  %v531_v18 = vrot.slane %v514_v14, 2  ;;  %v526_v19 = vrot.slane %v514_v14, 6 }
 0x195   : > { %550 = vst.msk [vmem:[#allocation3] sm:$0xff] %vm411_vm13, %v540_v16  ;;  %v543_v20 = vsel %vm279_vm6, %v542_v15, %v521_v6 }
 0x196   : > { %v533_v21 = vsel %vm281_vm7, %v531_v18, %v532_v1  ;;  %v544_v22 = vsel %vm281_vm7, %v543_v20, %v514_v14  ;;  %v549_v23 = vsel %vm238_vm0, %v548_v12, %v528_v17  ;;  %vm1023_vm0 = vmmov 0   ;;  %v833_v1 = vld [vmem:[%s1273_s4] ss:$0 sm:$0xff] }
 0x197   : > { %v545_v24 = vsel %vm283_vm8, %v544_v22, %v526_v19  ;;  %v546_v25 = vsel %vm259_vm1, %v528_v17, %v533_v21  ;;  %554 = vst.msk [vmem:[#allocation3 + $0x18] sm:$0xf] %vm553_vm12, %v549_v23  ;;  %883 = vmatprep.mubr.msk.bf16.mxu1 %vm1023_vm0, %v1022_v49  ;;  %vm606_vm1 = vcmask 392192   ;;  %vm612_vm7 = vcmask 654336  }
 0x198   : > { %551 = vst.msk [vmem:[#allocation3 + $0x8] sm:$0xff] %vm411_vm13, %v545_v24  ;;  %552 = vst.msk [vmem:[#allocation3 + $0x10] sm:$0xff] %vm411_vm13, %v546_v25  ;;  %vm615_vm8 = vcmask 785408  }
 0x19f   : > { %v560_v28 = vld [vmem:[#allocation3 + $0x1] ss:$2 sm:$0xff]  ;;  %v562_v29 = vld [vmem:[#allocation3 + $0x11] ss:$2 sm:$0x3f] }
 0x1a0   : > { %v563_v30 = vpack.c.bf16 %v562_v29, %v560_v28  ;;  %v555_v31 = vld [vmem:[#allocation3] ss:$2 sm:$0xff]  ;;  %v557_v32 = vld [vmem:[#allocation3 + $0x10] ss:$2 sm:$0x3f] }
 0x1a1   : > { %v558_v34 = vpack.c.bf16 %v557_v32, %v555_v31 }
 0x1a2   : > { %565 = vrot.lane.b32.xlu0 %v563_v30, %s1016_s11  ;;  %v579_v35 = vshll.u32 %v563_v30, 16  ;;  %v589_v40 = vrot.slane %v563_v30, 1  ;;  %v577_v41 = vshrl.u32 %v563_v30, 16  ;;  %s1026_s11 = smov 32  }
 0x1a3   : > { %v586_v36 = vrot.slane %v558_v34, 1  ;;  %v568_v38 = vshrl.u32 %v558_v34, 16  ;;  %v570_v39 = vshll.u32 %v558_v34, 16 }
 0x1a4   : > { %v581_v37 = vrot.slane %v579_v35, 1  ;;  %v597_v47 = vrot.slane %v577_v41, 1  ;;  %v598_v48 = vrot.slane %v579_v35, 2 }
 0x1a5   : > { %587 = vrot.lane.b32.xlu1 %v586_v36, %s1024_s8  ;;  %v572_v42 = vrot.slane %v570_v39, 1  ;;  %v592_v44 = vrot.slane %v568_v38, 1  ;;  %v593_v45 = vrot.slane %v570_v39, 2  ;;  %s951_s8 = scalar_lea.vmem %s1227_s26, 128 }
 0x1a6   : > { %590 = vrot.lane.b32.xlu0 %v589_v40, %s1025_s9  ;;  %v582_v46 = vor.u32 %v581_v37, %v577_v41  ;;  %v599_v49 = vor.u32 %v598_v48, %v597_v47  ;;  %p952_p11 = scmp.ne.s32.totalorder %s1227_s26, %s951_s8  ;;  %s1030_s9 = smov [#allocation4]  }
 0x1a7   : > { %v573_v43 = vor.u32 %v572_v42, %v568_v38  ;;  %v594_v50 = vor.u32 %v593_v45, %v592_v44 }
 0x1a8   : > { %p953_p12 = pnand %p952_p11, %p1099_p5 }
 0x1a9   : > { %574 = vrot.lane.b32.xlu1 %v573_v43, %s1026_s11  ;;  %s955_s11 = sshll.u32 %s1030_s9, 4  ;;  %s956_s11 = int_to_ptr.vmem [resolvable:$false] %s955_s11 }
 0x1aa   : > { %583 = vrot.lane.b32.xlu0 %v582_v46, %s1027_s10  ;;  %p954_p13 = pneg %p953_p12  ;;  %s957_s10 = scalar_lea.vmem %s956_s11, 256 }
 0x1ab   : > { %p958_p0 = scmp.lt.s32.totalorder %s1227_s26, %s956_s11  ;;  %p959_p1 = scmp.lt.s32.totalorder %s957_s10, %s951_s8 }
 0x1ad   : > { %595 = vrot.lane.b32.xlu1 %v594_v50, %s1028_s12  ;;  %p960_p2 = por %p959_p1, %p958_p0 }
 0x1ae   : > { %600 = vrot.lane.b32.xlu0 %v599_v49, %s1029_s13 }
 0x1af   : > { %p961_p3 = pnand %p960_p2, %p954_p13 }
 0x214   : > { %v566_v51 = vpop.permute.xlu0 %565 }
 0x215   : > { %v603_v54 = vsel %vm411_vm13, %v558_v34, %v566_v51 }
 0x217   : > { %v588_v52 = vpop.permute.xlu1 %587 }
 0x218   : > { %v591_v53 = vpop.permute.xlu0 %590 }
 0x21b   : > { %v575_v55 = vpop.permute.xlu1 %574 }
 0x21c   : > { %v605_v56 = vsel %vm454_vm9, %v603_v54, %v575_v55  ;;  %v584_v57 = vpop.permute.xlu0 %583 }
 0x21d   : > { %v608_v58 = vsel %vm606_vm1, %v605_v56, %v584_v57 }
 0x21e   : > { %v611_v59 = vsel %vm609_vm2, %v608_v58, %v588_v52 }
 0x21f   : > { %v614_v60 = vsel %vm612_vm7, %v611_v59, %v591_v53  ;;  %v596_v61 = vpop.permute.xlu1 %595 }
 0x220   : > { %v617_v62 = vsel %vm615_vm8, %v614_v60, %v596_v61  ;;  %v601_v63 = vpop.permute.xlu0 %600 }
 0x221   : > { %v620_v0 = vsel %vm618_vm14, %v617_v62, %v601_v63 }
 0x222   : > { %884 = vmatmul.mubr.bf16.vlgmr.msra.gmra.mrb[0].mxu1 %v620_v0 }
 0x2f5   : > { %v727_v2 = vpop.f32.mrb[0].mxu1 }
 0x2f6   : > { %v728_v3 = vadd.f32 %v833_v1, %v727_v2  ;;  %v885_v4 = vpop.f32.mrb[1].mxu1 }
 0x2f7   : > { %v730_v5 = vpop.f32.mrb[2].mxu1 }
 0x2f8   : > { %vm734_vm13 = vcmp.ge.f32.partialorder %v728_v3, 0.0  ;;  %v736_v6 = vmul.f32 0.2, %v728_v3  ;;  %v731_v7 = vadd.f32 %v833_v1, %v730_v5  ;;  %v886_v8 = vpop.f32.mrb[3].mxu1 }
 0x2fa   : > { %v738_v9 = vsel %vm734_vm13, %v728_v3, %v736_v6  ;;  %vm735_vm15 = vcmp.ge.f32.partialorder %v731_v7, 0.0  ;;  %v737_v10 = vmul.f32 0.2, %v731_v7 }
 0x2fb   : > { %v742_v12 = vrot.slane %v738_v9, 3 }
 0x2fc   : > { %v739_v11 = vsel %vm735_vm15, %v731_v7, %v737_v10 }
 0x2fd   : > { %v743_v13 = vrot.slane %v739_v11, 3 }
 0x2ff   : > { %v744_v14 = vsel %vm279_vm6, %v742_v12, %v743_v13 }
 0x300   : > { %v746_v15 = vsel %vm277_vm5, %v738_v9, %v744_v14 }
 0x301   : > { %747 = vst.msk [vmem:[%s218_s25] sm:$0xff] %vm454_vm9, %v746_v15 }
 0x302   : > { %964 = shalt.err (!%p961_p3)
}
 0x303   : > { %s965_s12 = scalar_lea.hbm %s1225_s7, 128  ;;  %s969_s15 = scalar_lea.hbm %s1274_s5, 256 }
 0x304   : > { %p966_p4 = scmp.ne.s32.totalorder %s1225_s7, %s965_s12  ;;  %p970_p9 = scmp.lt.u32.totalorder %s1225_s7, %s1274_s5 }
 0x305   : > { %p971_p10 = scmp.lt.u32.totalorder %s969_s15, %s965_s12  ;;  %p973_p12 = scmp.lt.u32.totalorder %s965_s12, %s1225_s7 }
 0x306   : > { %p967_p7 = pnand %p966_p4, %p1099_p5 }
 0x307   : > { %p972_p11 = por %p971_p10, %p970_p9 }
 0x308   : > { %p968_p8 = pneg %p967_p7 }
 0x309   : > { %p974_p13 = por %p973_p12, %p972_p11 }
 0x30b   : > { %p975_p0 = pnand %p974_p13, %p968_p8 }
 0x30d   : > { %978 = shalt.err (!%p975_p0)
}
 0x30e   : > { %887 = dma.vmem_to_hbm [thread:$0]  (%p1099_p5), %s1227_s26, 128, %s1225_s7, %s749_s22  }
 0x30f PF: > { %p893_p1 = scmp.ge.s32.totalorder %s1013_s21, 2  ;;  %s774_s23 = sand.u32 1, %s1001_s18  }
 0x310   : > { %s775_s25 = scalar_lea.sflag [#allocation5], %s774_s23 }
 0x311   : > { %p890_p2 = pnand %p893_p1, %p1103_p6 }
 0x313   : > { %996 = dma.done.wait (!%p890_p2), %s775_s25, 128  }
 0x314   : > { %998 = vsyncadd (!%p890_p2), %s775_s25, 4294967168  ;;  %p15_p3 = scmp.ge.s32.totalorder %s1086_s24, 4   ;;  %s1277_s18 = smov %s1005_s19 }
 0x315   : > { %s1278_s19 = smov %s1009_s20  ;;  %s1279_s20 = smov %s1097_s27 }
 0x316   : > { %s1280_s21 = smov %s1086_s24  ;;  %17 = sbr.rel (!%p15_p3) target bundleno = 3 (0x3), region = 83 }
 0x31d   :  { %780 = vsyncpa [#allocation5], 1 }
 0x31e   :  { %782 = vsyncpa [#allocation5 + $0x1], 1 }

</bundles_post_ra>
